<compile_context>
chip_gen: v6e
topology: v6e:2x2x1
jax: 0.10.0
libtpu: 0.0.40
codegen_flags: <defaults>
</compile_context>

<pallas_src>
import functools

import jax
import jax.numpy as jnp
from jax import lax
from jax.experimental import pallas as pl
from jax.experimental.pallas import tpu as pltpu


def _prenorm_kernel(x_ref, w_ref, b_ref, o_ref, *, eps, small_c):
    # x_ref: (1, C, S)   w_ref: (C, C) with gain g pre-folded   b_ref: (C, 1)
    # o_ref: (1, C, S)
    x = x_ref[0].astype(jnp.float32)                       # (C, S)
    c = x.shape[0]
    inv_c = jnp.float32(1.0 / c)

    # --- channel LayerNorm, single sweep: var = E[x^2] - (E[x])^2 ---
    s1 = jnp.sum(x, axis=0, keepdims=True)                 # (1, S)
    s2 = jnp.sum(x * x, axis=0, keepdims=True)             # (1, S)
    mean = s1 * inv_c
    var = s2 * inv_c - mean * mean
    xn = (x - mean) * lax.rsqrt(var + eps)                 # (C, S) f32

    # --- fn: pointwise conv, y = W_eff @ xn + b ---
    if small_c:
        # Tiny-C path: unrolled VPU broadcast-FMA, MXU bypass.
        # Bias folded into the accumulator init (one fewer (C, S) pass).
        w = w_ref[...].astype(jnp.float32)                 # (C, C), tiny
        acc = b_ref[...].astype(jnp.float32) + w[:, 0:1] * xn[0:1, :]
        for i in range(1, c):
            acc = acc + w[:, i:i + 1] * xn[i:i + 1, :]
        y = acc
    else:
        # MXU path: contract W axis 1 with xn axis 0 (no transpose), in the
        # input dtype (bf16-native MXU), f32 accumulation.
        xn_mm = xn.astype(x_ref.dtype)
        y = jnp.dot(w_ref[...], xn_mm, preferred_element_type=jnp.float32)
        y = y + b_ref[...].astype(jnp.float32)

    o_ref[0] = y.astype(o_ref.dtype)


def prenorm_pointwise(x, g, weight, bias, *, tile_s=1024):
    """PreNorm(C, Conv1d(C, C, 1))(x) for x of shape (B, C, L)."""
    b, c, l = x.shape
    # eps matches the PyTorch module: 1e-5 for f32 inputs, 1e-3 otherwise.
    eps = 1e-5 if x.dtype == jnp.float32 else 1e-3

    # Fold the LayerNorm gain into the conv weight:  W @ diag(g) == W * g^T.
    w_eff = (weight * g.reshape(1, c)).astype(weight.dtype)
    b2d = bias.reshape(c, 1)

    itemsize = jnp.dtype(x.dtype).itemsize
    lane = 128
    if l <= lane:
        tile_s = l                                         # full-extent block
    else:
        # Lane tile stays a multiple of 128; cdiv grid masks the tail block.
        tile_s = min(tile_s, pl.cdiv(l, lane) * lane)
        tile_s = max(lane, (tile_s // lane) * lane)

        # VMEM budget (~20 MiB): double-buffered in/out blocks + f32 temps + W.
        def vmem_bytes(ts):
            blocks = 2 * 2 * c * ts * itemsize             # in + out, 2-deep
            temps = 4 * c * ts * 4                         # x, xn, y + slack (f32)
            return blocks + temps + c * c * itemsize

        budget = 20 * (1 << 20)
        while tile_s > lane and vmem_bytes(tile_s) > budget:
            tile_s = max(lane, (tile_s // 2 // lane) * lane)

        # Keep >= 2 total grid steps so v7x's two TensorCores both get work.
        while b * pl.cdiv(l, tile_s) < 2 and tile_s > lane:
            tile_s = max(lane, (tile_s // 2 // lane) * lane)

    num_s = pl.cdiv(l, tile_s)
    small_c = c <= 8                                       # MXU bypass only for tiny C

    kernel = functools.partial(_prenorm_kernel, eps=eps, small_c=small_c)

    out = pl.pallas_call(
        kernel,
        out_shape=jax.ShapeDtypeStruct((b, c, l), x.dtype),
        grid_spec=pltpu.PrefetchScalarGridSpec(
            num_scalar_prefetch=0,
            grid=(b, num_s),
            in_specs=[
                pl.BlockSpec((1, c, tile_s), lambda bi, si: (bi, 0, si)),  # x
                pl.BlockSpec((c, c), lambda bi, si: (0, 0)),               # W*g (resident)
                pl.BlockSpec((c, 1), lambda bi, si: (0, 0)),               # bias (resident)
            ],
            out_specs=pl.BlockSpec((1, c, tile_s), lambda bi, si: (bi, 0, si)),
        ),
        compiler_params=pltpu.CompilerParams(
            dimension_semantics=("parallel", "parallel"),
            vmem_limit_bytes=48 << 20,
        ),
    )(x, w_eff, b2d)
    return out


if __name__ == "__main__":
    key = jax.random.PRNGKey(0)
    kx, kg, kw, kb = jax.random.split(key, 4)

    # (B, C, L): batch=2, channels=4, seq=256 (e.g. flattened 16x16 spatial).
    B, C, L = 2, 4, 256
    x = jax.random.normal(kx, (B, C, L), dtype=jnp.float32)

    # Module parameters: LayerNorm gain g (1, C, 1); synthesized fn = Conv1d(C, C, 1).
    g = 1.0 + 0.1 * jax.random.normal(kg, (1, C, 1), dtype=jnp.float32)
    weight = jax.random.normal(kw, (C, C), dtype=jnp.float32) * 0.1
    bias = jax.random.normal(kb, (C,), dtype=jnp.float32) * 0.1

    out = prenorm_pointwise(x, g, weight, bias)
    out = jax.block_until_ready(out)

    # Pure-JAX reference: fn(LayerNorm(x))
    mean = jnp.mean(x, axis=1, keepdims=True)
    var = jnp.mean(jnp.square(x - mean), axis=1, keepdims=True)
    xn = (x - mean) * lax.rsqrt(var + 1e-5) * g
    ref = jnp.einsum("oc,bcl->bol", weight, xn) + bias[None, :, None]

    assert out.shape == x.shape and out.dtype == x.dtype
    assert jnp.allclose(out, ref, atol=1e-4, rtol=1e-4)

    print("KERNEL_OK")
</pallas_src>

<mosaic_0001>
module attributes {stable_mosaic.version = 11 : i64} {
  func.func @_prenorm_kernel(%arg0: i32, %arg1: i32, %arg2: memref<1x4x256xf32, #tpu.memory_space<vmem>>, %arg3: memref<4x4xf32, #tpu.memory_space<vmem>>, %arg4: memref<4x1xf32, #tpu.memory_space<vmem>>, %arg5: memref<1x4x256xf32, #tpu.memory_space<vmem>>) attributes {dimension_semantics = [#tpu.dimension_semantics<parallel>, #tpu.dimension_semantics<parallel>], iteration_bounds = array<i64: 2, 1>, scalar_prefetch = 0 : i64, scratch_operands = 0 : i64, tpu.core_type = #tpu.core_type<tc>, window_params = [{transform_indices = @transform_0, window_bounds = array<i64: 1, 4, 256>}, {pipeline_mode = #tpu.pipeline_mode<synchronous>, transform_indices = @transform_1, window_bounds = array<i64: 4, 4>}, {pipeline_mode = #tpu.pipeline_mode<synchronous>, transform_indices = @transform_2, window_bounds = array<i64: 4, 1>}, {transform_indices = @transform_3, window_bounds = array<i64: 1, 4, 256>}]} {
    %c0 = arith.constant 0 : index
    %c0_0 = arith.constant 0 : index
    %c0_1 = arith.constant 0 : index
    %0 = vector.load %arg2[%c0, %c0_0, %c0_1] : memref<1x4x256xf32, #tpu.memory_space<vmem>>, vector<1x4x256xf32>
    %1 = vector.shape_cast %0 : vector<1x4x256xf32> to vector<4x256xf32>
    %cst = arith.constant dense<0.000000e+00> : vector<256xf32>
    %2 = vector.multi_reduction <add>, %1, %cst [0] : vector<4x256xf32> to vector<256xf32>
    %3 = vector.shape_cast %2 : vector<256xf32> to vector<1x256xf32>
    %4 = arith.mulf %1, %1 : vector<4x256xf32>
    %cst_2 = arith.constant dense<0.000000e+00> : vector<256xf32>
    %5 = vector.multi_reduction <add>, %4, %cst_2 [0] : vector<4x256xf32> to vector<256xf32>
    %6 = vector.shape_cast %5 : vector<256xf32> to vector<1x256xf32>
    %cst_3 = arith.constant 2.500000e-01 : f32
    %7 = vector.broadcast %cst_3 : f32 to vector<1x256xf32>
    %8 = arith.mulf %3, %7 : vector<1x256xf32>
    %cst_4 = arith.constant 2.500000e-01 : f32
    %9 = vector.broadcast %cst_4 : f32 to vector<1x256xf32>
    %10 = arith.mulf %6, %9 : vector<1x256xf32>
    %11 = arith.mulf %8, %8 : vector<1x256xf32>
    %12 = arith.subf %10, %11 : vector<1x256xf32>
    %13 = vector.broadcast %8 : vector<1x256xf32> to vector<4x256xf32>
    %14 = arith.subf %1, %13 : vector<4x256xf32>
    %cst_5 = arith.constant 9.99999974E-6 : f32
    %15 = vector.broadcast %cst_5 : f32 to vector<1x256xf32>
    %16 = arith.addf %12, %15 : vector<1x256xf32>
    %17 = math.rsqrt %16 : vector<1x256xf32>
    %18 = vector.broadcast %17 : vector<1x256xf32> to vector<4x256xf32>
    %19 = arith.mulf %14, %18 : vector<4x256xf32>
    %c0_6 = arith.constant 0 : index
    %c0_7 = arith.constant 0 : index
    %20 = vector.load %arg3[%c0_6, %c0_7] : memref<4x4xf32, #tpu.memory_space<vmem>>, vector<4x4xf32>
    %c0_8 = arith.constant 0 : index
    %c0_9 = arith.constant 0 : index
    %21 = vector.load %arg4[%c0_8, %c0_9] : memref<4x1xf32, #tpu.memory_space<vmem>>, vector<4x1xf32>
    %22 = vector.extract_strided_slice %20 {offsets = [0, 0], sizes = [4, 1], strides = [1, 1]} : vector<4x4xf32> to vector<4x1xf32>
    %23 = vector.extract_strided_slice %19 {offsets = [0, 0], sizes = [1, 256], strides = [1, 1]} : vector<4x256xf32> to vector<1x256xf32>
    %24 = vector.broadcast %22 : vector<4x1xf32> to vector<4x256xf32>
    %25 = vector.broadcast %23 : vector<1x256xf32> to vector<4x256xf32>
    %26 = arith.mulf %24, %25 : vector<4x256xf32>
    %27 = vector.broadcast %21 : vector<4x1xf32> to vector<4x256xf32>
    %28 = arith.addf %27, %26 : vector<4x256xf32>
    %29 = vector.extract_strided_slice %20 {offsets = [0, 1], sizes = [4, 1], strides = [1, 1]} : vector<4x4xf32> to vector<4x1xf32>
    %30 = vector.extract_strided_slice %19 {offsets = [1, 0], sizes = [1, 256], strides = [1, 1]} : vector<4x256xf32> to vector<1x256xf32>
    %31 = vector.broadcast %29 : vector<4x1xf32> to vector<4x256xf32>
    %32 = vector.broadcast %30 : vector<1x256xf32> to vector<4x256xf32>
    %33 = arith.mulf %31, %32 : vector<4x256xf32>
    %34 = arith.addf %28, %33 : vector<4x256xf32>
    %35 = vector.extract_strided_slice %20 {offsets = [0, 2], sizes = [4, 1], strides = [1, 1]} : vector<4x4xf32> to vector<4x1xf32>
    %36 = vector.extract_strided_slice %19 {offsets = [2, 0], sizes = [1, 256], strides = [1, 1]} : vector<4x256xf32> to vector<1x256xf32>
    %37 = vector.broadcast %35 : vector<4x1xf32> to vector<4x256xf32>
    %38 = vector.broadcast %36 : vector<1x256xf32> to vector<4x256xf32>
    %39 = arith.mulf %37, %38 : vector<4x256xf32>
    %40 = arith.addf %34, %39 : vector<4x256xf32>
    %41 = vector.extract_strided_slice %20 {offsets = [0, 3], sizes = [4, 1], strides = [1, 1]} : vector<4x4xf32> to vector<4x1xf32>
    %42 = vector.extract_strided_slice %19 {offsets = [3, 0], sizes = [1, 256], strides = [1, 1]} : vector<4x256xf32> to vector<1x256xf32>
    %43 = vector.broadcast %41 : vector<4x1xf32> to vector<4x256xf32>
    %44 = vector.broadcast %42 : vector<1x256xf32> to vector<4x256xf32>
    %45 = arith.mulf %43, %44 : vector<4x256xf32>
    %46 = arith.addf %40, %45 : vector<4x256xf32>
    %c0_10 = arith.constant 0 : index
    %c0_11 = arith.constant 0 : index
    %c0_12 = arith.constant 0 : index
    %47 = vector.load %arg5[%c0_10, %c0_11, %c0_12] : memref<1x4x256xf32, #tpu.memory_space<vmem>>, vector<1x4x256xf32>
    %48 = vector.shape_cast %47 : vector<1x4x256xf32> to vector<4x256xf32>
    %49 = vector.shape_cast %46 : vector<4x256xf32> to vector<1x4x256xf32>
    tpu.vector_store %arg5[%c0_10, %c0_11, %c0_12], %49 {strides = array<i32>} : memref<1x4x256xf32, #tpu.memory_space<vmem>>, vector<1x4x256xf32>,
    return
  }
  func.func @transform_0(%arg0: i32, %arg1: i32) -> (i32, i32, i32) {
    %c0_i32 = arith.constant 0 : i32
    %c0_i32_0 = arith.constant 0 : i32
    return %arg0, %c0_i32, %arg1 : i32, i32, i32
  }
  func.func @transform_1(%arg0: i32, %arg1: i32) -> (i32, i32) {
    %c0_i32 = arith.constant 0 : i32
    %c0_i32_0 = arith.constant 0 : i32
    %c0_i32_1 = arith.constant 0 : i32
    return %c0_i32, %c0_i32_0 : i32, i32
  }
  func.func @transform_2(%arg0: i32, %arg1: i32) -> (i32, i32) {
    %c0_i32 = arith.constant 0 : i32
    %c0_i32_0 = arith.constant 0 : i32
    %c0_i32_1 = arith.constant 0 : i32
    return %c0_i32, %c0_i32_0 : i32, i32
  }
  func.func @transform_3(%arg0: i32, %arg1: i32) -> (i32, i32, i32) {
    %c0_i32 = arith.constant 0 : i32
    %c0_i32_0 = arith.constant 0 : i32
    return %arg0, %c0_i32, %arg1 : i32, i32, i32
  }
}

</mosaic_0001>

<bundles_post_ra>
// kernel: tpu_custom_call.1
= control target key start
LH: loop header
LB: loop body
LE: loop exit
PB: predicated region body
PF: predicated region fallthrough
CT: control target
= control target key end

     0   :  { %8 = vsyncpa [#allocation3], 0  ;;  %s857_s0 = inlined_call_operand.hbm [shape: f32[2,4,256], index: 0, kind: input, shape index: {}]   ;;  %s858_s1 = inlined_call_operand.vmem [shape: f32[4,4], index: 1, kind: input, shape index: {}]   ;;  %s859_s2 = inlined_call_operand.vmem [shape: f32[4,1], index: 2, kind: input, shape index: {}]   ;;  %s860_s3 = inlined_call_operand.hbm [shape: f32[2,4,256], index: 3, kind: output, shape index: {}]  }
   0x1   :  { %10 = vsyncpa [#allocation3 + $0x1], 0 }
   0x2   :  { %11 = vsyncpa [#allocation4], 0 }
   0x3   :  { %13 = vsyncpa [#allocation4 + $0x1], 0  ;;  %s713_s12 = smov 0   ;;  %s715_s13 = smov 0  }
   0x4   :  { %s717_s14 = smov 0   ;;  %s719_s15 = smov 0  }
   0x5   :  { %s721_s16 = smov 0   ;;  %s723_s17 = smov 0  }
   0x6 LB: > { %s485_s18 = sadd.s32 4294967295, %s685_s17   ;;  %s486_s19 = sadd.s32 4294967294, %s685_s17   ;;  %s685_s17 = sphi %s723_s17, %s19_s17   ;;  %s681_s16 = sphi %s721_s16, %s872_s16   ;;  %s677_s15 = sphi %s719_s15, %s871_s15   ;;  %s673_s14 = sphi %s717_s14, %s870_s14   ;;  %s669_s13 = sphi %s715_s13, %s869_s13   ;;  %s665_s12 = sphi %s713_s12, %s868_s12  }
   0x7   : > { %s31_s20 = sadd.s32 1, %s681_s16  ;;  %s40_s21 = sadd.s32 1, %s673_s14 }
   0x8   : > { %p33_p0 = scmp.ge.s32.totalorder %s31_s20, 2  ;;  %p47_p1 = scmp.ne.s32.totalorder %s673_s14, %s669_s13 }
   0x9   : > { %p48_p2 = scmp.eq.s32.totalorder %s685_s17, 0  ;;  %p53_p3 = scmp.ne.s32.totalorder %s669_s13, %s665_s12 }
   0xa   : > { %s874_s20 = smov (%p33_p0, %s31_s20), 0  ;;  %p54_p5 = scmp.eq.s32.totalorder %s485_s18, 0 }
   0xb   : > { %p754_p4 = por %p48_p2, %p47_p1  ;;  %s35_s23 = ssub.s32 %s681_s16, %s874_s20 }
   0xc   : > { %p121_p6 = scmp.eq.s32.totalorder %s485_s18, 1  ;;  %p38_p7 = scmp.eq.s32.totalorder %s35_s23, 0 }
   0xd   : > { %p760_p8 = por %p54_p5, %p53_p3  ;;  %p127_p10 = scmp.eq.s32.totalorder %s486_s19, 1 }
   0xe   : > { %p764_p9 = por %p121_p6, %p47_p1  ;;  %p514_p13 = scmp.lt.s32.totalorder %s685_s17, 2 }
   0xf   : > { %s769_s26 = scalar_select %p38_p7, %s673_s14, %s40_s21  }
  0x10   : > { %p771_p11 = por %p127_p10, %p53_p3  ;;  %s153_s28 = sand.u32 1, %s673_s14  }
  0x11   : > { %s489_s29 = sshll.u32 %s153_s28, 3  ;;  %s500_s30 = sshll.u32 %s681_s16, 7 }
  0x12   : > { %s864_s27 = scalar_select %p771_p11, 1, 0 }
  0x13   : > { %s165_s6 = scalar_lea.hbm %s857_s0, %s500_s30  ;;  %s157_s7 = scalar_lea.vmem [#allocation2], %s489_s29 }
  0x14   : > { %s167_s8 = sshll.u32 %s157_s7, 4  ;;  %p784_p0 = pnand %p514_p13, %p754_p4  ;;  %s168_s8 = int_to_ptr.vmem [resolvable:$true] %s167_s8 }
  0x15   : > { %p492_p1 = scmp.ge.s32.totalorder %s685_s17, 1  ;;  %p172_p2 = scmp.lt.s32.totalorder %s685_s17, 3 }
  0x16   : > { %s154_s10 = scalar_lea.sflag [#allocation3], %s153_s28  ;;  %p579_p3 = pneg %p784_p0 }
  0x17   : > { %s590_s11 = scalar_lea.vmem %s168_s8, 128  ;;  %s687_s18 = smov [#allocation2]  }
  0x18   : > { %p591_p5 = scmp.ne.s32.totalorder %s168_s8, %s590_s11  ;;  %s595_s19 = sshll.u32 %s687_s18, 4  ;;  %s596_s19 = int_to_ptr.vmem [resolvable:$false] %s595_s19 }
  0x19   : > { %s597_s21 = scalar_lea.vmem %s596_s19, 256  ;;  %p598_p10 = scmp.lt.s32.totalorder %s168_s8, %s596_s19 }
  0x1a   : > { %p593_p6 = pnand %p591_p5, %p579_p3  ;;  %p599_p12 = scmp.lt.s32.totalorder %s597_s21, %s590_s11 }
  0x1c   : > { %p594_p7 = pneg %p593_p6  ;;  %p600_p4 = por %p599_p12, %p598_p10 }
  0x1e   : > { %p601_p13 = pnand %p600_p4, %p594_p7 }
  0x20   : > { %604 = shalt.err (!%p601_p13)
}
  0x21   : > { %509 = dma.hbm_to_vmem [thread:$0]  (!%p784_p0), %s165_s6, 128, %s168_s8, %s154_s10  }
  0x22   : > { %p173_p11 = pnand %p492_p1, %p172_p2 }
  0x23   : > { %s799_s22 = sand.u32 (!%p173_p11), 1, %s669_s13  }
  0x24   : > { %176 = sbr.rel (%p173_p11) target bundleno = 196 (0xc4), region = 32  ;;  %s493_s23 = sshll.u32 (!%p173_p11), %s799_s22, 3 }
  0x25   : > { %s179_s28 = scalar_lea.sflag (!%p173_p11), [#allocation3], %s799_s22  ;;  %s182_s29 = scalar_lea.vmem (!%p173_p11), [#allocation2], %s493_s23 }
  0x29   : > { %656 = dma.done.wait (%p760_p8), %s179_s28, 128  }
  0x2a   : > { %658 = vsyncadd (%p760_p8), %s179_s28, 4294967168  ;;  %v688_v0 = vmov 0   ;;  %v689_v1 = vmov 1   ;;  %v266_v2 = vld [vmem:[%s858_s1] sm:$0xf]  ;;  %v690_v4 = vmov 2   ;;  %v274_v49 = vlaneseq }
  0x2b   : > { %568 = vset.pattern.permute.xlu0 %v688_v0  ;;  %569 = vset.pattern.permute.xlu1 %v689_v1  ;;  %v267_v3 = vld [vmem:[%s859_s2] sm:$0xf]  ;;  %v691_v5 = vmov 3   ;;  %vm211_vm0 = vcmask 1043456   ;;  %s501_s24 = sshll.u32 %s677_s15, 7  ;;  %s204_s7 = scalar_lea.vmem [#allocation5], %s493_s23 }
  0x2c   : > { %270 = vperm.xlu0 %568, %v266_v2   ;;  %302 = vperm.xlu1 %569, %v266_v2   ;;  %v207_v6 = vld [vmem:[%s182_s29] sm:$0xff]  ;;  %v275_v52 = vshrl.u32 %v274_v49, 7  ;;  %s401_s8 = sshll.u32 %s204_s7, 4  ;;  %s399_s11 = scalar_lea.hbm %s860_s3, %s501_s24  ;;  %s402_s8 = int_to_ptr.vmem [resolvable:$true] %s401_s8 }
  0x2d   : > { %v209_v7 = vcombine.high %v207_v6, %v207_v6  ;;  %v226_v8 = vmul.f32 %v207_v6, %v207_v6  ;;  %v212_v9 = vsel %vm211_vm0, %v207_v6, 0.0  ;;  %s385_s18 = scalar_lea.sflag [#allocation4], %s799_s22  ;;  %s605_s19 = scalar_lea.vmem %s402_s8, 128 }
  0x2e   : > { %v213_v12 = vrot.slane %v212_v9, 4  ;;  %v276_v55 = vsub.s32 0, %v275_v52  ;;  %v280_v56 = vsub.s32 4, %v275_v52  ;;  %v307_v58 = vsub.s32 1, %v275_v52  ;;  %p606_p8 = scmp.ne.s32.totalorder %s402_s8, %s605_s19  ;;  %s692_s21 = smov [#allocation5]  }
  0x2f   : > { %v228_v10 = vcombine.high %v226_v8, %v226_v8  ;;  %v219_v11 = vsel %vm211_vm0, %v209_v7, 0.0  ;;  %v230_v13 = vsel %vm211_vm0, %v226_v8, 0.0  ;;  %v311_v59 = vsub.s32 5, %v275_v52  ;;  %s609_s15 = sshll.u32 %s692_s21, 4  ;;  %s610_s15 = int_to_ptr.vmem [resolvable:$false] %s609_s15 }
  0x30   : > { %296 = vperm.xlu0 %568, %v267_v3   ;;  %570 = vset.pattern.permute.xlu1 %v690_v4  ;;  %v220_v14 = vrot.slane %v219_v11, 4  ;;  %v231_v16 = vrot.slane %v230_v13, 4  ;;  %v214_v17 = vadd.f32 %v213_v12, %v212_v9  ;;  %v333_v60 = vsub.s32 2, %v275_v52  ;;  %p607_p11 = pnand %p606_p8, %p764_p9  ;;  %s611_s23 = scalar_lea.vmem %s610_s15, 256 }
  0x31   : > { %328 = vperm.xlu1 %570, %v266_v2   ;;  %v237_v15 = vsel %vm211_vm0, %v228_v10, 0.0  ;;  %v337_v61 = vsub.s32 6, %v275_v52  ;;  %v359_v4 = vsub.s32 3, %v275_v52  ;;  %p612_p0 = scmp.lt.s32.totalorder %s402_s8, %s610_s15  ;;  %p613_p1 = scmp.lt.s32.totalorder %s611_s23, %s605_s19 }
  0x32   : > { %v238_v18 = vrot.slane %v237_v15, 4  ;;  %v221_v19 = vadd.f32 %v220_v14, %v219_v11  ;;  %v232_v20 = vadd.f32 %v231_v16, %v230_v13  ;;  %v215_v21 = vrot.slane %v214_v17, 2  ;;  %p608_p12 = pneg %p607_p11 }
  0x33   : > { %p614_p2 = por %p613_p1, %p612_p0 }
  0x34   : > { %571 = vset.pattern.permute.xlu0 %v691_v5  ;;  %v239_v22 = vadd.f32 %v238_v18, %v237_v15  ;;  %v222_v23 = vrot.slane %v221_v19, 2  ;;  %v233_v24 = vrot.slane %v232_v20, 2  ;;  %v216_v25 = vadd.f32 %v215_v21, %v214_v17 }
  0x35   : > { %354 = vperm.xlu0 %571, %v266_v2   ;;  %v363_v5 = vsub.s32 7, %v275_v52  ;;  %p615_p3 = pnand %p614_p2, %p608_p12 }
  0x36   : > { %v223_v26 = vadd.f32 %v222_v23, %v221_v19  ;;  %v240_v27 = vrot.slane %v239_v22, 2  ;;  %v217_v28 = vrot.slane %v216_v25, 1  ;;  %v234_v29 = vadd.f32 %v233_v24, %v232_v20 }
  0x38   : > { %v224_v30 = vrot.slane %v223_v26, 1  ;;  %v241_v31 = vadd.f32 %v240_v27, %v239_v22  ;;  %v218_v32 = vadd.f32 %v217_v28, %v216_v25  ;;  %v235_v33 = vrot.slane %v234_v29, 1 }
  0x3a   : > { %v225_v34 = vadd.f32 %v224_v30, %v223_v26  ;;  %v242_v35 = vrot.slane %v241_v31, 1  ;;  %v236_v36 = vadd.f32 %v235_v33, %v234_v29  ;;  %v244_v37 = vmul.f32 0.25, %v218_v32 }
  0x3c   : > { %v243_v38 = vadd.f32 %v242_v35, %v241_v31  ;;  %v245_v39 = vmul.f32 0.25, %v225_v34  ;;  %v246_v40 = vmul.f32 0.25, %v236_v36  ;;  %v248_v41 = vmul.f32 %v244_v37, %v244_v37 }
  0x3e   : > { %v247_v42 = vmul.f32 0.25, %v243_v38  ;;  %v249_v43 = vmul.f32 %v245_v39, %v245_v39  ;;  %v250_v44 = vsub.f32 %v246_v40, %v248_v41  ;;  %v254_v50 = vcombine.low %v244_v37, %v245_v39 }
  0x40   : > { %v251_v45 = vsub.f32 %v247_v42, %v249_v43  ;;  %v257_v46 = vadd.f32 1e-05, %v250_v44  ;;  %v256_v53 = vsub.f32 %v207_v6, %v254_v50 }
  0x42   : > { %v258_v47 = vadd.f32 1e-05, %v251_v45  ;;  %573 = vrsqrt.f32 %v257_v46 }
  0x44   : > { %575 = vrsqrt.f32 %v258_v47 }
  0x4f   : > { %v574_v48 = vpop.eup %573 }
  0x51   : > { %v576_v51 = vpop.eup %575 }
  0x52   : > { %v263_v54 = vcombine.low %v574_v48, %v576_v51 }
  0x54   : > { %v265_v57 = vmul.f32 %v263_v54, %v256_v53 }
  0x56   : > { %v277_v62 = vrot.slane %v265_v57, %v276_v55  ;;  %v281_v63 = vrot.slane %v265_v57, %v280_v56  ;;  %v308_v0 = vrot.slane %v265_v57, %v307_v58  ;;  %v312_v1 = vrot.slane %v265_v57, %v311_v59 }
  0x57   : > { %v334_v2 = vrot.slane %v265_v57, %v333_v60  ;;  %v338_v3 = vrot.slane %v265_v57, %v337_v61  ;;  %v360_v14 = vrot.slane %v265_v57, %v359_v4  ;;  %v364_v15 = vrot.slane %v265_v57, %v363_v5 }
  0x58   : > { %v287_v7 = vrot.slane %v277_v62, %v276_v55  ;;  %v291_v8 = vrot.slane %v281_v63, %v276_v55  ;;  %v318_v10 = vrot.slane %v308_v0, %v307_v58  ;;  %v322_v11 = vrot.slane %v312_v1, %v307_v58 }
  0x59   : > { %v344_v12 = vrot.slane %v334_v2, %v333_v60  ;;  %v348_v13 = vrot.slane %v338_v3, %v333_v60  ;;  %v370_v26 = vrot.slane %v360_v14, %v359_v4  ;;  %v374_v27 = vrot.slane %v364_v15, %v359_v4 }
  0xa7   : > { %v271_v9 = vpop.permute.xlu0 %270  ;;  %v303_v6 = vpop.permute.xlu1 %302 }
  0xa8   : > { %v292_v16 = vmul.f32 %v287_v7, %v271_v9  ;;  %v293_v17 = vmul.f32 %v291_v8, %v271_v9  ;;  %v323_v19 = vmul.f32 %v318_v10, %v303_v6  ;;  %v324_v20 = vmul.f32 %v322_v11, %v303_v6 }
  0xab   : > { %v297_v18 = vpop.permute.xlu0 %296 }
  0xac   : > { %v299_v21 = vadd.f32 %v297_v18, %v292_v16  ;;  %v300_v22 = vadd.f32 %v297_v18, %v293_v17  ;;  %v329_v23 = vpop.permute.xlu1 %328 }
  0xad   : > { %v349_v24 = vmul.f32 %v344_v12, %v329_v23  ;;  %v350_v25 = vmul.f32 %v348_v13, %v329_v23 }
  0xae   : > { %v325_v28 = vadd.f32 %v323_v19, %v299_v21  ;;  %v326_v29 = vadd.f32 %v324_v20, %v300_v22 }
  0xb0   : > { %v351_v30 = vadd.f32 %v349_v24, %v325_v28  ;;  %v352_v31 = vadd.f32 %v350_v25, %v326_v29  ;;  %v355_v32 = vpop.permute.xlu0 %354 }
  0xb1   : > { %v375_v33 = vmul.f32 %v370_v26, %v355_v32  ;;  %v376_v34 = vmul.f32 %v374_v27, %v355_v32 }
  0xb3   : > { %v377_v35 = vadd.f32 %v375_v33, %v351_v30  ;;  %v378_v36 = vadd.f32 %v376_v34, %v352_v31 }
  0xb5   : > { %v381_v37 = vcombine.low %v377_v35, %v378_v36 }
  0xb7   : > { %383 = vst [vmem:[%s204_s7] sm:$0xff] %v381_v37 }
  0xb8   : > { %618 = shalt.err (!%p615_p3)
}
  0xb9   : > { %s619_s28 = scalar_lea.hbm %s399_s11, 128  ;;  %s623_s30 = scalar_lea.hbm %s860_s3, 256 }
  0xba   : > { %p620_p5 = scmp.ne.s32.totalorder %s399_s11, %s619_s28  ;;  %p624_p10 = scmp.lt.s32.totalorder %s399_s11, %s860_s3 }
  0xbb   : > { %p625_p4 = scmp.lt.s32.totalorder %s623_s30, %s619_s28 }
  0xbc   : > { %p621_p6 = pnand %p620_p5, %p764_p9 }
  0xbd   : > { %p626_p13 = por %p625_p4, %p624_p10 }
  0xbe   : > { %p622_p7 = pneg %p621_p6 }
  0xc0   : > { %p627_p8 = pnand %p626_p13, %p622_p7 }
  0xc2   : > { %630 = shalt.err (!%p627_p8)
}
  0xc3   : > { %504 = dma.vmem_to_hbm [thread:$0]  (%p764_p9), %s402_s8, 128, %s399_s11, %s385_s18  }
  0xc4 PF: > { %s413_s6 = sand.u32 1, %s665_s12   ;;  %p866_p11 = scmp.ne.s32.totalorder %s864_s27, 0 }
  0xc5   : > { %p867_p12 = scmp.ge.s32.totalorder %s685_s17, 2  ;;  %s414_s24 = scalar_lea.sflag [#allocation4], %s413_s6 }
  0xc7   : > { %p511_p0 = pnand %p867_p12, %p866_p11 }
  0xc9   : > { %p512_p1 = pneg %p511_p0 }
  0xcb   : > { %660 = dma.done.wait (%p512_p1), %s414_s24, 128  }
  0xcc   : > { %662 = vsyncadd (%p512_p1), %s414_s24, 4294967168  ;;  %s19_s17 = sadd.s32 1, %s685_s17   ;;  %s868_s12 = smov %s669_s13 }
  0xcd   : > { %p16_p2 = scmp.ge.s32.totalorder %s19_s17, 4   ;;  %s869_s13 = smov %s673_s14 }
  0xce   : > { %s870_s14 = smov %s769_s26  ;;  %s871_s15 = smov %s681_s16 }
  0xcf   : > { %s872_s16 = smov %s874_s20  ;;  %18 = sbr.rel (!%p16_p2) target bundleno = 6 (0x6), region = 77 }
  0xd4   :  { %419 = vsyncpa [#allocation3], 1 }
  0xd5   :  { %421 = vsyncpa [#allocation3 + $0x1], 1 }
  0xd6   :  { %422 = vsyncpa [#allocation4], 1 }
  0xd7   :  { %424 = vsyncpa [#allocation4 + $0x1], 1 }

</bundles_post_ra>
